<compile_context>
chip_gen: v7x
topology: tpu7x:2x2x1
jax: 0.10.0
libtpu: 0.0.40
codegen_flags: <defaults>
</compile_context>

<pallas_src>
import functools

import jax
import jax.numpy as jnp
from jax.experimental import pallas as pl
from jax.experimental.pallas import tpu as pltpu


# ---------------------------------------------------------------------------
# Pass A: depthwise conv + pointwise 1x1 conv + per-tile moments.
# ---------------------------------------------------------------------------
def conv_moments_kernel(x_ref, dwr_ref, pwb_ref, y_ref, mom_ref, *,
                        k, row_tile, wo, cin):
    # x_ref  : (Hp, Wp*Cin)        padded input image for this batch element (channel-interleaved)
    # dwr_ref: (k*k, Wo*Cin)       depthwise tap weights, tiled across W
    # pwb_ref: (Wo*Cin, Wo*Cout)   block-diagonal pointwise weight = kron(I_Wo, pw)
    # y_ref  : (row_tile, Wo*Cout) pre-BN conv output tile (lane dense)
    # mom_ref: (2, Wo*Cout)        per-tile [sum, sum of squares] over the tile rows
    r = pl.program_id(1)
    row0 = pl.multiple_of(r * row_tile, row_tile)
    lci = wo * cin

    # Depthwise conv: unrolled over k*k taps, each tap a ref-sliced offset load, f32 VPU MACs.
    acc = jnp.zeros((row_tile, lci), jnp.float32)
    for dy in range(k):
        for dx in range(k):
            tap = x_ref[pl.ds(row0 + dy, row_tile), pl.ds(dx * cin, lci)]
            w_tap = dwr_ref[pl.ds(dy * k + dx, 1), :]            # (1, Wo*Cin)
            acc = acc + tap * w_tap

    # Pointwise 1x1 conv: one lane-dense MXU matmul that directly yields the interleaved
    # (rows, Wo*Cout) layout -> no in-kernel reshape / relayout, no masked stores.
    y = jnp.dot(acc, pwb_ref[...], preferred_element_type=jnp.float32)
    y_ref[...] = y

    # Per-tile moments; global BN stats are reduced outside (var = E[y^2] - E[y]^2).
    mom_ref[0:1, :] = jnp.sum(y, axis=0, keepdims=True)
    mom_ref[1:2, :] = jnp.sum(y * y, axis=0, keepdims=True)


# ---------------------------------------------------------------------------
# Pass B: fused BatchNorm normalize + affine + ReLU (pure VPU, lane dense).
# ---------------------------------------------------------------------------
def bn_relu_kernel(y_ref, scale_ref, shift_ref, o_ref):
    o_ref[...] = jnp.maximum(y_ref[...] * scale_ref[...] + shift_ref[...], 0.0)


def _pick_row_tile(ho):
    for cand in (256, 128, 64, 32, 16, 8):
        if ho % cand == 0:
            return cand
    return ho


@functools.partial(jax.jit, static_argnames=("kernel_size", "padding", "eps", "row_tile"))
def sepcbr_forward(x_nchw, dw_w, pw_w, gamma, beta, *, kernel_size, padding,
                   eps=1e-5, row_tile=None):
    """x_nchw: (N,Cin,H,W); dw_w: (Cin,1,k,k); pw_w: (Cout,Cin,1,1); gamma/beta: (Cout,)."""
    N, Cin, H, W = x_nchw.shape
    Cout = pw_w.shape[0]
    k, p = kernel_size, padding
    Ho = H + 2 * p - k + 1
    Wo = W + 2 * p - k + 1
    Hp, Wp = H + 2 * p, W + 2 * p
    # TODO(synk): SepConv2d.set_stride (stride>1 with channel halving) not implemented; stride=1 assumed.
    if row_tile is None:
        row_tile = _pick_row_tile(Ho)
    assert Ho % row_tile == 0, "row_tile must divide the output height"
    R = Ho // row_tile
    LCI = Wo * Cin            # interleaved input-channel lane width
    LCO = Wo * Cout           # interleaved output-channel lane width (128 for demo shapes)

    # ---- layout glue -------------------------------------------------------
    # TODO(synk): keep NHWC end-to-end in the surrounding model and fold the zero padding into
    # the kernel (index_map + edge masking) to remove these HBM round trips; the op is HBM-bound.
    x = jnp.transpose(x_nchw, (0, 2, 3, 1)).astype(jnp.float32)          # NHWC
    x = jnp.pad(x, ((0, 0), (p, p), (p, p), (0, 0)))                     # (N, Hp, Wp, Cin)
    x2 = x.reshape(N, Hp, Wp * Cin)                                      # channel-interleaved rows

    dw_taps = jnp.transpose(dw_w[:, 0, :, :], (1, 2, 0)).reshape(k * k, Cin)
    dw_rows = jnp.tile(dw_taps.astype(jnp.float32), (1, Wo))             # (k*k, Wo*Cin)
    pw_mat = jnp.transpose(pw_w[:, :, 0, 0], (1, 0)).astype(jnp.float32)  # (Cin, Cout)
    pw_big = jnp.kron(jnp.eye(Wo, dtype=jnp.float32), pw_mat)            # (Wo*Cin, Wo*Cout)

    grid = (N, R)
    vmem_budget = 32 * 1024 * 1024   # blocks here are KB-scale; fits v5e/v6e/v7x scoped VMEM

    # ---- pass A: conv + per-tile moments -----------------------------------
    flops_a = 2 * N * Ho * Wo * Cin * k * k + 2 * N * Ho * LCI * LCO + 4 * N * Ho * LCO
    bytes_a = 4 * (N * Hp * Wp * Cin + k * k * LCI + LCI * LCO + N * Ho * LCO + N * R * 2 * LCO)
    y, mom = pl.pallas_call(
        functools.partial(conv_moments_kernel, k=k, row_tile=row_tile, wo=Wo, cin=Cin),
        out_shape=(jax.ShapeDtypeStruct((N, Ho, LCO), jnp.float32),
                   jax.ShapeDtypeStruct((N, R, 2, LCO), jnp.float32)),
        grid_spec=pltpu.PrefetchScalarGridSpec(
            num_scalar_prefetch=0,
            grid=grid,
            in_specs=[
                # Per-image padded input; block index constant across r -> fetched once per n.
                pl.BlockSpec((None, Hp, Wp * Cin), lambda n, r: (n, 0, 0)),
                pl.BlockSpec((k * k, LCI), lambda n, r: (0, 0)),
                pl.BlockSpec((LCI, LCO), lambda n, r: (0, 0)),
            ],
            out_specs=(
                pl.BlockSpec((None, row_tile, LCO), lambda n, r: (n, r, 0)),
                pl.BlockSpec((None, None, 2, LCO), lambda n, r: (n, r, 0, 0)),
            ),
        ),
        compiler_params=pltpu.CompilerParams(
            dimension_semantics=("parallel", "parallel"),
            vmem_limit_bytes=vmem_budget),
        cost_estimate=pl.CostEstimate(flops=flops_a, transcendentals=0, bytes_accessed=bytes_a),
    )(x2, dw_rows, pw_big)

    # ---- tiny global BN-stat reduction (training-mode batch statistics) -----
    sums = mom.sum(axis=(0, 1)).reshape(2, Wo, Cout).sum(axis=1)          # (2, Cout)
    cnt = float(N * Ho * Wo)
    mean = sums[0] / cnt
    var = jnp.maximum(sums[1] / cnt - mean * mean, 0.0)   # biased var (BN training normalization)
    inv_std = jax.lax.rsqrt(var + eps)
    scale = gamma.astype(jnp.float32) * inv_std
    shift = beta.astype(jnp.float32) - mean * scale
    scale_row = jnp.tile(scale, Wo).reshape(1, LCO)
    shift_row = jnp.tile(shift, Wo).reshape(1, LCO)

    # ---- pass B: normalize + affine + ReLU ----------------------------------
    flops_b = 3 * N * Ho * LCO
    bytes_b = 4 * (2 * N * Ho * LCO + 2 * LCO)
    out2 = pl.pallas_call(
        bn_relu_kernel,
        out_shape=jax.ShapeDtypeStruct((N, Ho, LCO), jnp.float32),
        grid_spec=pltpu.PrefetchScalarGridSpec(
            num_scalar_prefetch=0,
            grid=grid,
            in_specs=[
                pl.BlockSpec((None, row_tile, LCO), lambda n, r: (n, r, 0)),
                pl.BlockSpec((1, LCO), lambda n, r: (0, 0)),
                pl.BlockSpec((1, LCO), lambda n, r: (0, 0)),
            ],
            out_specs=pl.BlockSpec((None, row_tile, LCO), lambda n, r: (n, r, 0)),
        ),
        compiler_params=pltpu.CompilerParams(
            dimension_semantics=("parallel", "parallel"),
            vmem_limit_bytes=vmem_budget),
        cost_estimate=pl.CostEstimate(flops=flops_b, transcendentals=0, bytes_accessed=bytes_b),
    )(y, scale_row, shift_row)

    out = out2.reshape(N, Ho, Wo, Cout)
    return jnp.transpose(out, (0, 3, 1, 2))               # back to NCHW at the module boundary


def sepcbr_reference(x, dw_w, pw_w, gamma, beta, *, padding, eps=1e-5):
    """Pure-JAX reference (matches PyTorch SepCBR.forward in training mode)."""
    Cin = x.shape[1]
    y = jax.lax.conv_general_dilated(
        x, dw_w, (1, 1), [(padding, padding)] * 2,
        dimension_numbers=("NCHW", "OIHW", "NCHW"), feature_group_count=Cin)
    y = jax.lax.conv_general_dilated(
        y, pw_w, (1, 1), [(0, 0)] * 2,
        dimension_numbers=("NCHW", "OIHW", "NCHW"))
    mean = y.mean(axis=(0, 2, 3), keepdims=True)
    var = ((y - mean) ** 2).mean(axis=(0, 2, 3), keepdims=True)
    yhat = (y - mean) * jax.lax.rsqrt(var + eps)
    out = yhat * gamma.reshape(1, -1, 1, 1) + beta.reshape(1, -1, 1, 1)
    return jnp.maximum(out, 0.0)


if __name__ == "__main__":
    # small shapes consistent with the module
    N, Cin, Cout, H, W = 2, 4, 8, 16, 16
    kernel_size, padding = 3, 1

    key = jax.random.PRNGKey(0)
    kx, kdw, kpw = jax.random.split(key, 3)

    x = jax.random.normal(kx, (N, Cin, H, W), jnp.float32)
    dw_w = 0.1 * jax.random.normal(kdw, (Cin, 1, kernel_size, kernel_size), jnp.float32)
    pw_w = 0.1 * jax.random.normal(kpw, (Cout, Cin, 1, 1), jnp.float32)
    gamma = jnp.ones((Cout,), jnp.float32)    # BatchNorm2d default weight
    beta = jnp.zeros((Cout,), jnp.float32)    # BatchNorm2d default bias

    out = sepcbr_forward(x, dw_w, pw_w, gamma, beta,
                         kernel_size=kernel_size, padding=padding, row_tile=8)
    out = jax.block_until_ready(out)

    ref = sepcbr_reference(x, dw_w, pw_w, gamma, beta, padding=padding)
    assert out.shape == (N, Cout, H, W)
    assert jnp.allclose(out, ref, atol=1e-3, rtol=1e-3), "mismatch vs reference"

    print("KERNEL_OK")
</pallas_src>

<mosaic_0001>
module attributes {stable_mosaic.version = 11 : i64} {
  func.func @conv_moments_kernel(%arg0: i32, %arg1: i32, %arg2: memref<1x18x72xf32, #tpu.memory_space<vmem>>, %arg3: memref<9x64xf32, #tpu.memory_space<vmem>>, %arg4: memref<64x128xf32, #tpu.memory_space<vmem>>, %arg5: memref<1x8x128xf32, #tpu.memory_space<vmem>>, %arg6: memref<1x1x2x128xf32, #tpu.memory_space<vmem>>) attributes {dimension_semantics = [#tpu.dimension_semantics<parallel>, #tpu.dimension_semantics<parallel>], iteration_bounds = array<i64: 2, 2>, scalar_prefetch = 0 : i64, scratch_operands = 0 : i64, tpu.core_type = #tpu.core_type<tc>, window_params = [{transform_indices = @transform_0, window_bounds = array<i64: 1, 18, 72>}, {pipeline_mode = #tpu.pipeline_mode<synchronous>, transform_indices = @transform_1, window_bounds = array<i64: 9, 64>}, {pipeline_mode = #tpu.pipeline_mode<synchronous>, transform_indices = @transform_2, window_bounds = array<i64: 64, 128>}, {transform_indices = @transform_3, window_bounds = array<i64: 1, 8, 128>}, {transform_indices = @transform_4, window_bounds = array<i64: 1, 1, 2, 128>}]} {
    %c8_i32 = arith.constant 8 : i32
    %0 = arith.muli %arg1, %c8_i32 : i32
    %1 = tpu.assume_multiple %0, 8 : i32
    %cst = arith.constant 0.000000e+00 : f32
    %2 = vector.broadcast %cst : f32 to vector<8x64xf32>
    %c0_i32 = arith.constant 0 : i32
    %3 = arith.addi %1, %c0_i32 : i32
    %c0 = arith.constant 0 : index
    %4 = arith.index_cast %3 : i32 to index
    %c0_0 = arith.constant 0 : index
    %5 = vector.load %arg2[%c0, %4, %c0_0] : memref<1x18x72xf32, #tpu.memory_space<vmem>>, vector<1x8x64xf32>
    %6 = vector.shape_cast %5 : vector<1x8x64xf32> to vector<8x64xf32>
    %c0_1 = arith.constant 0 : index
    %c0_2 = arith.constant 0 : index
    %7 = vector.load %arg3[%c0_1, %c0_2] : memref<9x64xf32, #tpu.memory_space<vmem>>, vector<1x64xf32>
    %8 = vector.broadcast %7 : vector<1x64xf32> to vector<8x64xf32>
    %9 = arith.mulf %6, %8 : vector<8x64xf32>
    %10 = arith.addf %2, %9 : vector<8x64xf32>
    %c0_i32_3 = arith.constant 0 : i32
    %11 = arith.addi %1, %c0_i32_3 : i32
    %c0_4 = arith.constant 0 : index
    %12 = arith.index_cast %11 : i32 to index
    %c4 = arith.constant 4 : index
    %13 = vector.load %arg2[%c0_4, %12, %c4] : memref<1x18x72xf32, #tpu.memory_space<vmem>>, vector<1x8x64xf32>
    %14 = vector.shape_cast %13 : vector<1x8x64xf32> to vector<8x64xf32>
    %c1 = arith.constant 1 : index
    %c0_5 = arith.constant 0 : index
    %15 = vector.load %arg3[%c1, %c0_5] : memref<9x64xf32, #tpu.memory_space<vmem>>, vector<1x64xf32>
    %16 = vector.broadcast %15 : vector<1x64xf32> to vector<8x64xf32>
    %17 = arith.mulf %14, %16 : vector<8x64xf32>
    %18 = arith.addf %10, %17 : vector<8x64xf32>
    %c0_i32_6 = arith.constant 0 : i32
    %19 = arith.addi %1, %c0_i32_6 : i32
    %c0_7 = arith.constant 0 : index
    %20 = arith.index_cast %19 : i32 to index
    %c8 = arith.constant 8 : index
    %21 = vector.load %arg2[%c0_7, %20, %c8] : memref<1x18x72xf32, #tpu.memory_space<vmem>>, vector<1x8x64xf32>
    %22 = vector.shape_cast %21 : vector<1x8x64xf32> to vector<8x64xf32>
    %c2 = arith.constant 2 : index
    %c0_8 = arith.constant 0 : index
    %23 = vector.load %arg3[%c2, %c0_8] : memref<9x64xf32, #tpu.memory_space<vmem>>, vector<1x64xf32>
    %24 = vector.broadcast %23 : vector<1x64xf32> to vector<8x64xf32>
    %25 = arith.mulf %22, %24 : vector<8x64xf32>
    %26 = arith.addf %18, %25 : vector<8x64xf32>
    %c1_i32 = arith.constant 1 : i32
    %27 = arith.addi %1, %c1_i32 : i32
    %c0_9 = arith.constant 0 : index
    %28 = arith.index_cast %27 : i32 to index
    %c0_10 = arith.constant 0 : index
    %29 = vector.load %arg2[%c0_9, %28, %c0_10] : memref<1x18x72xf32, #tpu.memory_space<vmem>>, vector<1x8x64xf32>
    %30 = vector.shape_cast %29 : vector<1x8x64xf32> to vector<8x64xf32>
    %c3 = arith.constant 3 : index
    %c0_11 = arith.constant 0 : index
    %31 = vector.load %arg3[%c3, %c0_11] : memref<9x64xf32, #tpu.memory_space<vmem>>, vector<1x64xf32>
    %32 = vector.broadcast %31 : vector<1x64xf32> to vector<8x64xf32>
    %33 = arith.mulf %30, %32 : vector<8x64xf32>
    %34 = arith.addf %26, %33 : vector<8x64xf32>
    %c1_i32_12 = arith.constant 1 : i32
    %35 = arith.addi %1, %c1_i32_12 : i32
    %c0_13 = arith.constant 0 : index
    %36 = arith.index_cast %35 : i32 to index
    %c4_14 = arith.constant 4 : index
    %37 = vector.load %arg2[%c0_13, %36, %c4_14] : memref<1x18x72xf32, #tpu.memory_space<vmem>>, vector<1x8x64xf32>
    %38 = vector.shape_cast %37 : vector<1x8x64xf32> to vector<8x64xf32>
    %c4_15 = arith.constant 4 : index
    %c0_16 = arith.constant 0 : index
    %39 = vector.load %arg3[%c4_15, %c0_16] : memref<9x64xf32, #tpu.memory_space<vmem>>, vector<1x64xf32>
    %40 = vector.broadcast %39 : vector<1x64xf32> to vector<8x64xf32>
    %41 = arith.mulf %38, %40 : vector<8x64xf32>
    %42 = arith.addf %34, %41 : vector<8x64xf32>
    %c1_i32_17 = arith.constant 1 : i32
    %43 = arith.addi %1, %c1_i32_17 : i32
    %c0_18 = arith.constant 0 : index
    %44 = arith.index_cast %43 : i32 to index
    %c8_19 = arith.constant 8 : index
    %45 = vector.load %arg2[%c0_18, %44, %c8_19] : memref<1x18x72xf32, #tpu.memory_space<vmem>>, vector<1x8x64xf32>
    %46 = vector.shape_cast %45 : vector<1x8x64xf32> to vector<8x64xf32>
    %c5 = arith.constant 5 : index
    %c0_20 = arith.constant 0 : index
    %47 = vector.load %arg3[%c5, %c0_20] : memref<9x64xf32, #tpu.memory_space<vmem>>, vector<1x64xf32>
    %48 = vector.broadcast %47 : vector<1x64xf32> to vector<8x64xf32>
    %49 = arith.mulf %46, %48 : vector<8x64xf32>
    %50 = arith.addf %42, %49 : vector<8x64xf32>
    %c2_i32 = arith.constant 2 : i32
    %51 = arith.addi %1, %c2_i32 : i32
    %c0_21 = arith.constant 0 : index
    %52 = arith.index_cast %51 : i32 to index
    %c0_22 = arith.constant 0 : index
    %53 = vector.load %arg2[%c0_21, %52, %c0_22] : memref<1x18x72xf32, #tpu.memory_space<vmem>>, vector<1x8x64xf32>
    %54 = vector.shape_cast %53 : vector<1x8x64xf32> to vector<8x64xf32>
    %c6 = arith.constant 6 : index
    %c0_23 = arith.constant 0 : index
    %55 = vector.load %arg3[%c6, %c0_23] : memref<9x64xf32, #tpu.memory_space<vmem>>, vector<1x64xf32>
    %56 = vector.broadcast %55 : vector<1x64xf32> to vector<8x64xf32>
    %57 = arith.mulf %54, %56 : vector<8x64xf32>
    %58 = arith.addf %50, %57 : vector<8x64xf32>
    %c2_i32_24 = arith.constant 2 : i32
    %59 = arith.addi %1, %c2_i32_24 : i32
    %c0_25 = arith.constant 0 : index
    %60 = arith.index_cast %59 : i32 to index
    %c4_26 = arith.constant 4 : index
    %61 = vector.load %arg2[%c0_25, %60, %c4_26] : memref<1x18x72xf32, #tpu.memory_space<vmem>>, vector<1x8x64xf32>
    %62 = vector.shape_cast %61 : vector<1x8x64xf32> to vector<8x64xf32>
    %c7 = arith.constant 7 : index
    %c0_27 = arith.constant 0 : index
    %63 = vector.load %arg3[%c7, %c0_27] : memref<9x64xf32, #tpu.memory_space<vmem>>, vector<1x64xf32>
    %64 = vector.broadcast %63 : vector<1x64xf32> to vector<8x64xf32>
    %65 = arith.mulf %62, %64 : vector<8x64xf32>
    %66 = arith.addf %58, %65 : vector<8x64xf32>
    %c2_i32_28 = arith.constant 2 : i32
    %67 = arith.addi %1, %c2_i32_28 : i32
    %c0_29 = arith.constant 0 : index
    %68 = arith.index_cast %67 : i32 to index
    %c8_30 = arith.constant 8 : index
    %69 = vector.load %arg2[%c0_29, %68, %c8_30] : memref<1x18x72xf32, #tpu.memory_space<vmem>>, vector<1x8x64xf32>
    %70 = vector.shape_cast %69 : vector<1x8x64xf32> to vector<8x64xf32>
    %c8_31 = arith.constant 8 : index
    %c0_32 = arith.constant 0 : index
    %71 = vector.load %arg3[%c8_31, %c0_32] : memref<9x64xf32, #tpu.memory_space<vmem>>, vector<1x64xf32>
    %72 = vector.broadcast %71 : vector<1x64xf32> to vector<8x64xf32>
    %73 = arith.mulf %70, %72 : vector<8x64xf32>
    %74 = arith.addf %66, %73 : vector<8x64xf32>
    %c0_33 = arith.constant 0 : index
    %c0_34 = arith.constant 0 : index
    %75 = vector.load %arg4[%c0_33, %c0_34] : memref<64x128xf32, #tpu.memory_space<vmem>>, vector<64x128xf32>
    %cst_35 = arith.constant dense<0.000000e+00> : vector<8x128xf32>
    %76 = tpu.matmul %74, %75, %cst_35 {dimension_numbers = #tpu.dot_dimension_numbers<[1], [0], [0], [1], [0, 0, 1, 1], [], []>} : vector<8x64xf32>, vector<64x128xf32>, vector<8x128xf32> -> vector<8x128xf32>
    %c0_36 = arith.constant 0 : index
    %c0_37 = arith.constant 0 : index
    %c0_38 = arith.constant 0 : index
    %77 = vector.load %arg5[%c0_36, %c0_37, %c0_38] : memref<1x8x128xf32, #tpu.memory_space<vmem>>, vector<1x8x128xf32>
    %78 = vector.shape_cast %77 : vector<1x8x128xf32> to vector<8x128xf32>
    %79 = vector.shape_cast %76 : vector<8x128xf32> to vector<1x8x128xf32>
    tpu.vector_store %arg5[%c0_36, %c0_37, %c0_38], %79 {strides = array<i32>} : memref<1x8x128xf32, #tpu.memory_space<vmem>>, vector<1x8x128xf32>,
    %cst_39 = arith.constant dense<0.000000e+00> : vector<128xf32>
    %80 = vector.multi_reduction <add>, %76, %cst_39 [0] : vector<8x128xf32> to vector<128xf32>
    %81 = vector.shape_cast %80 : vector<128xf32> to vector<1x128xf32>
    %c0_40 = arith.constant 0 : index
    %c0_41 = arith.constant 0 : index
    %c0_42 = arith.constant 0 : index
    %c0_43 = arith.constant 0 : index
    %82 = vector.load %arg6[%c0_40, %c0_41, %c0_42, %c0_43] : memref<1x1x2x128xf32, #tpu.memory_space<vmem>>, vector<1x1x1x128xf32>
    %83 = vector.shape_cast %82 : vector<1x1x1x128xf32> to vector<1x128xf32>
    %84 = vector.shape_cast %81 : vector<1x128xf32> to vector<1x1x1x128xf32>
    tpu.vector_store %arg6[%c0_40, %c0_41, %c0_42, %c0_43], %84 {strides = array<i32>} : memref<1x1x2x128xf32, #tpu.memory_space<vmem>>, vector<1x1x1x128xf32>,
    %85 = arith.mulf %76, %76 : vector<8x128xf32>
    %cst_44 = arith.constant dense<0.000000e+00> : vector<128xf32>
    %86 = vector.multi_reduction <add>, %85, %cst_44 [0] : vector<8x128xf32> to vector<128xf32>
    %87 = vector.shape_cast %86 : vector<128xf32> to vector<1x128xf32>
    %c0_45 = arith.constant 0 : index
    %c0_46 = arith.constant 0 : index
    %c1_47 = arith.constant 1 : index
    %c0_48 = arith.constant 0 : index
    %88 = vector.load %arg6[%c0_45, %c0_46, %c1_47, %c0_48] : memref<1x1x2x128xf32, #tpu.memory_space<vmem>>, vector<1x1x1x128xf32>
    %89 = vector.shape_cast %88 : vector<1x1x1x128xf32> to vector<1x128xf32>
    %90 = vector.shape_cast %87 : vector<1x128xf32> to vector<1x1x1x128xf32>
    tpu.vector_store %arg6[%c0_45, %c0_46, %c1_47, %c0_48], %90 {strides = array<i32>} : memref<1x1x2x128xf32, #tpu.memory_space<vmem>>, vector<1x1x1x128xf32>,
    return
  }
  func.func @transform_0(%arg0: i32, %arg1: i32) -> (i32, i32, i32) {
    %c0_i32 = arith.constant 0 : i32
    %c0_i32_0 = arith.constant 0 : i32
    %c0_i32_1 = arith.constant 0 : i32
    return %arg0, %c0_i32, %c0_i32_0 : i32, i32, i32
  }
  func.func @transform_1(%arg0: i32, %arg1: i32) -> (i32, i32) {
    %c0_i32 = arith.constant 0 : i32
    %c0_i32_0 = arith.constant 0 : i32
    %c0_i32_1 = arith.constant 0 : i32
    return %c0_i32, %c0_i32_0 : i32, i32
  }
  func.func @transform_2(%arg0: i32, %arg1: i32) -> (i32, i32) {
    %c0_i32 = arith.constant 0 : i32
    %c0_i32_0 = arith.constant 0 : i32
    %c0_i32_1 = arith.constant 0 : i32
    return %c0_i32, %c0_i32_0 : i32, i32
  }
  func.func @transform_3(%arg0: i32, %arg1: i32) -> (i32, i32, i32) {
    %c0_i32 = arith.constant 0 : i32
    %c0_i32_0 = arith.constant 0 : i32
    return %arg0, %arg1, %c0_i32 : i32, i32, i32
  }
  func.func @transform_4(%arg0: i32, %arg1: i32) -> (i32, i32, i32, i32) {
    %c0_i32 = arith.constant 0 : i32
    %c0_i32_0 = arith.constant 0 : i32
    %c0_i32_1 = arith.constant 0 : i32
    return %arg0, %arg1, %c0_i32, %c0_i32_0 : i32, i32, i32, i32
  }
}

module attributes {stable_mosaic.version = 11 : i64} {
  func.func @bn_relu_kernel(%arg0: i32, %arg1: i32, %arg2: memref<1x8x128xf32, #tpu.memory_space<vmem>>, %arg3: memref<1x128xf32, #tpu.memory_space<vmem>>, %arg4: memref<1x128xf32, #tpu.memory_space<vmem>>, %arg5: memref<1x8x128xf32, #tpu.memory_space<vmem>>) attributes {dimension_semantics = [#tpu.dimension_semantics<parallel>, #tpu.dimension_semantics<parallel>], iteration_bounds = array<i64: 2, 2>, scalar_prefetch = 0 : i64, scratch_operands = 0 : i64, tpu.core_type = #tpu.core_type<tc>, window_params = [{transform_indices = @transform_0, window_bounds = array<i64: 1, 8, 128>}, {pipeline_mode = #tpu.pipeline_mode<synchronous>, transform_indices = @transform_1, window_bounds = array<i64: 1, 128>}, {pipeline_mode = #tpu.pipeline_mode<synchronous>, transform_indices = @transform_2, window_bounds = array<i64: 1, 128>}, {transform_indices = @transform_3, window_bounds = array<i64: 1, 8, 128>}]} {
    %c0 = arith.constant 0 : index
    %c0_0 = arith.constant 0 : index
    %c0_1 = arith.constant 0 : index
    %0 = vector.load %arg2[%c0, %c0_0, %c0_1] : memref<1x8x128xf32, #tpu.memory_space<vmem>>, vector<1x8x128xf32>
    %1 = vector.shape_cast %0 : vector<1x8x128xf32> to vector<8x128xf32>
    %c0_2 = arith.constant 0 : index
    %c0_3 = arith.constant 0 : index
    %2 = vector.load %arg3[%c0_2, %c0_3] : memref<1x128xf32, #tpu.memory_space<vmem>>, vector<1x128xf32>
    %3 = vector.broadcast %2 : vector<1x128xf32> to vector<8x128xf32>
    %4 = arith.mulf %1, %3 : vector<8x128xf32>
    %c0_4 = arith.constant 0 : index
    %c0_5 = arith.constant 0 : index
    %5 = vector.load %arg4[%c0_4, %c0_5] : memref<1x128xf32, #tpu.memory_space<vmem>>, vector<1x128xf32>
    %6 = vector.broadcast %5 : vector<1x128xf32> to vector<8x128xf32>
    %7 = arith.addf %4, %6 : vector<8x128xf32>
    %cst = arith.constant 0.000000e+00 : f32
    %8 = vector.broadcast %cst : f32 to vector<8x128xf32>
    %9 = arith.maximumf %7, %8 : vector<8x128xf32>
    %c0_6 = arith.constant 0 : index
    %c0_7 = arith.constant 0 : index
    %c0_8 = arith.constant 0 : index
    %10 = vector.load %arg5[%c0_6, %c0_7, %c0_8] : memref<1x8x128xf32, #tpu.memory_space<vmem>>, vector<1x8x128xf32>
    %11 = vector.shape_cast %10 : vector<1x8x128xf32> to vector<8x128xf32>
    %12 = vector.shape_cast %9 : vector<8x128xf32> to vector<1x8x128xf32>
    tpu.vector_store %arg5[%c0_6, %c0_7, %c0_8], %12 {strides = array<i32>} : memref<1x8x128xf32, #tpu.memory_space<vmem>>, vector<1x8x128xf32>,
    return
  }
  func.func @transform_0(%arg0: i32, %arg1: i32) -> (i32, i32, i32) {
    %c0_i32 = arith.constant 0 : i32
    %c0_i32_0 = arith.constant 0 : i32
    return %arg0, %arg1, %c0_i32 : i32, i32, i32
  }
  func.func @transform_1(%arg0: i32, %arg1: i32) -> (i32, i32) {
    %c0_i32 = arith.constant 0 : i32
    %c0_i32_0 = arith.constant 0 : i32
    %c0_i32_1 = arith.constant 0 : i32
    return %c0_i32, %c0_i32_0 : i32, i32
  }
  func.func @transform_2(%arg0: i32, %arg1: i32) -> (i32, i32) {
    %c0_i32 = arith.constant 0 : i32
    %c0_i32_0 = arith.constant 0 : i32
    %c0_i32_1 = arith.constant 0 : i32
    return %c0_i32, %c0_i32_0 : i32, i32
  }
  func.func @transform_3(%arg0: i32, %arg1: i32) -> (i32, i32, i32) {
    %c0_i32 = arith.constant 0 : i32
    %c0_i32_0 = arith.constant 0 : i32
    return %arg0, %arg1, %c0_i32 : i32, i32, i32
  }
}

</mosaic_0001>

<bundles_post_ra>
// kernel: tile.21
= control target key start
LH: loop header
LB: loop body
LE: loop exit
PB: predicated region body
PF: predicated region fallthrough
CT: control target
= control target key end

     0   :  { %s28_s0 = inlined_call_operand.vmem [shape: f32[8], index: 0, kind: input, shape index: {}]   ;;  %s29_s1 = inlined_call_operand.vmem [shape: f32[16,8], index: 1, kind: output, shape index: {}]  }
   0x1   :  { %v4_v0 = vld [vmem:[%s28_s0] ss:$0 sm:$0xff] }
   0x2   :  { %5 = vst [vmem:[%s29_s1] sm:$0xff] %v4_v0  ;;  %8 = vst [vmem:[%s29_s1 + $0x8] sm:$0xff] %v4_v0 }

// kernel: tile.22
= control target key start
LH: loop header
LB: loop body
LE: loop exit
PB: predicated region body
PF: predicated region fallthrough
CT: control target
= control target key end

     0   :  { %s131_s10 = smov 120   ;;  %s132_s11 = smov 104   ;;  %vm3_vm0 = vcmask 64512   ;;  %vm9_vm1 = vcmask 1048512   ;;  %vm15_vm2 = vcmask 982912   ;;  %vm21_vm3 = vcmask 917312   ;;  %s207_s0 = inlined_call_operand.vmem [shape: f32[16,8], index: 0, kind: input, shape index: {}]   ;;  %s208_s1 = inlined_call_operand.vmem [shape: f32[1,128], index: 1, kind: output, shape index: {}]  }
   0x1   :  { %v101_v0 = vld [vmem:[%s207_s0 + $0xf] sm:$0x1]   ;;  %v103_v1 = vld [vmem:[%s207_s0 + $0xd] sm:$0x1]   ;;  %v102_v2 = vld [vmem:[%s207_s0 + $0xe] sm:$0x1]  }
   0x2   :  { %7 = vrot.lane.b32.xlu0 %v101_v0, %s131_s10  ;;  %19 = vrot.lane.b32.xlu1 %v103_v1, %s132_s11  ;;  %v104_v3 = vld [vmem:[%s207_s0 + $0xc] sm:$0x1]   ;;  %s133_s16 = smov 112   ;;  %s134_s17 = smov 96   ;;  %v105_v4 = vld [vmem:[%s207_s0 + $0xb] sm:$0x1]  }
   0x3   :  { %v106_v5 = vld [vmem:[%s207_s0 + $0xa] sm:$0x1]   ;;  %v2_v6 = vld [vmem:[%s207_s0] sm:$0x1]   ;;  %s135_s24 = smov 88   ;;  %s136_s25 = smov 80  }
   0x4   :  { %4 = vst.msk [vmem:[#allocation0] sm:$0x1] %vm3_vm0, %v2_v6   ;;  %v107_v7 = vld [vmem:[%s207_s0 + $0x9] sm:$0x1]   ;;  %v108_v8 = vld [vmem:[%s207_s0 + $0x8] sm:$0x1]  }
   0x5   :  { %s137_s30 = smov 72   ;;  %s138_s2 = smov 64   ;;  %v109_v9 = vld [vmem:[%s207_s0 + $0x7] sm:$0x1]   ;;  %v110_v10 = vld [vmem:[%s207_s0 + $0x6] sm:$0x1]  }
   0x6   :  { %13 = vrot.lane.b32.xlu0 %v102_v2, %s133_s16  ;;  %25 = vrot.lane.b32.xlu1 %v104_v3, %s134_s17  ;;  %s139_s7 = smov 56   ;;  %s140_s8 = smov 48   ;;  %v111_v11 = vld [vmem:[%s207_s0 + $0x5] sm:$0x1]   ;;  %v112_v12 = vld [vmem:[%s207_s0 + $0x4] sm:$0x1]  }
   0x7   :  { %s141_s13 = smov 40   ;;  %s142_s14 = smov 32   ;;  %v113_v13 = vld [vmem:[%s207_s0 + $0x3] sm:$0x1]   ;;  %v114_v14 = vld [vmem:[%s207_s0 + $0x2] sm:$0x1]  }
   0x8   :  { %s143_s19 = smov 24   ;;  %s144_s20 = smov 16   ;;  %v115_v15 = vld [vmem:[%s207_s0 + $0x1] sm:$0x1]   ;;  %vm27_vm4 = vcmask 851712   ;;  %vm33_vm5 = vcmask 786112  }
   0x9   :  { %s145_s0 = smov 8   ;;  %vm39_vm6 = vcmask 720512   ;;  %vm45_vm7 = vcmask 654912   ;;  %vm51_vm8 = vcmask 589312   ;;  %vm57_vm9 = vcmask 523712  }
   0xa   :  { %31 = vrot.lane.b32.xlu0 %v105_v4, %s135_s24  ;;  %37 = vrot.lane.b32.xlu1 %v106_v5, %s136_s25  ;;  %vm63_vm10 = vcmask 458112   ;;  %vm69_vm11 = vcmask 392512   ;;  %vm75_vm12 = vcmask 326912   ;;  %vm81_vm13 = vcmask 261312  }
   0xb   :  { %vm87_vm14 = vcmask 195712   ;;  %vm93_vm15 = vcmask 130112  }
   0xe   :  { %43 = vrot.lane.b32.xlu0 %v107_v7, %s137_s30  ;;  %49 = vrot.lane.b32.xlu1 %v108_v8, %s138_s2 }
  0x12   :  { %55 = vrot.lane.b32.xlu0 %v109_v9, %s139_s7  ;;  %61 = vrot.lane.b32.xlu1 %v110_v10, %s140_s8 }
  0x16   :  { %67 = vrot.lane.b32.xlu0 %v111_v11, %s141_s13  ;;  %73 = vrot.lane.b32.xlu1 %v112_v12, %s142_s14 }
  0x1a   :  { %79 = vrot.lane.b32.xlu0 %v113_v13, %s143_s19  ;;  %85 = vrot.lane.b32.xlu1 %v114_v14, %s144_s20 }
  0x1e   :  { %91 = vrot.lane.b32.xlu0 %v115_v15, %s145_s0 }
  0x74   :  { %v8_v16 = vpop.permute.xlu0 %7   ;;  %v20_v17 = vpop.permute.xlu1 %19  }
  0x75   :  { %10 = vst.msk [vmem:[#allocation0] sm:$0x1] %vm9_vm1, %v8_v16  }
  0x78   :  { %v14_v18 = vpop.permute.xlu0 %13   ;;  %v26_v19 = vpop.permute.xlu1 %25  }
  0x79   :  { %16 = vst.msk [vmem:[#allocation0] sm:$0x1] %vm15_vm2, %v14_v18  }
  0x7a   :  { %22 = vst.msk [vmem:[#allocation0] sm:$0x1] %vm21_vm3, %v20_v17  }
  0x7b   :  { %28 = vst.msk [vmem:[#allocation0] sm:$0x1] %vm27_vm4, %v26_v19  }
  0x7c   :  { %v32_v20 = vpop.permute.xlu0 %31   ;;  %v38_v21 = vpop.permute.xlu1 %37  }
  0x7d   :  { %34 = vst.msk [vmem:[#allocation0] sm:$0x1] %vm33_vm5, %v32_v20  }
  0x7e   :  { %40 = vst.msk [vmem:[#allocation0] sm:$0x1] %vm39_vm6, %v38_v21  }
  0x80   :  { %v44_v22 = vpop.permute.xlu0 %43   ;;  %v50_v23 = vpop.permute.xlu1 %49  }
  0x81   :  { %46 = vst.msk [vmem:[#allocation0] sm:$0x1] %vm45_vm7, %v44_v22  }
  0x82   :  { %52 = vst.msk [vmem:[#allocation0] sm:$0x1] %vm51_vm8, %v50_v23  }
  0x84   :  { %v56_v24 = vpop.permute.xlu0 %55   ;;  %v62_v25 = vpop.permute.xlu1 %61  }
  0x85   :  { %58 = vst.msk [vmem:[#allocation0] sm:$0x1] %vm57_vm9, %v56_v24  }
  0x86   :  { %64 = vst.msk [vmem:[#allocation0] sm:$0x1] %vm63_vm10, %v62_v25  }
  0x88   :  { %v68_v26 = vpop.permute.xlu0 %67   ;;  %v74_v27 = vpop.permute.xlu1 %73  }
  0x89   :  { %70 = vst.msk [vmem:[#allocation0] sm:$0x1] %vm69_vm11, %v68_v26  }
  0x8a   :  { %76 = vst.msk [vmem:[#allocation0] sm:$0x1] %vm75_vm12, %v74_v27  }
  0x8c   :  { %v80_v28 = vpop.permute.xlu0 %79   ;;  %v86_v29 = vpop.permute.xlu1 %85  }
  0x8d   :  { %82 = vst.msk [vmem:[#allocation0] sm:$0x1] %vm81_vm13, %v80_v28  }
  0x8e   :  { %88 = vst.msk [vmem:[#allocation0] sm:$0x1] %vm87_vm14, %v86_v29  }
  0x90   :  { %v92_v30 = vpop.permute.xlu0 %91  }
  0x91   :  { %94 = vst.msk [vmem:[#allocation0] sm:$0x1] %vm93_vm15, %v92_v30  }
  0x98   :  { %v98_v31 = vld [vmem:[#allocation0] sm:$0x1] }
  0x99   :  { %100 = vst [vmem:[%s208_s1] sm:$0x1] %v98_v31 }

// kernel: sepcbr_forward.3
= control target key start
LH: loop header
LB: loop body
LE: loop exit
PB: predicated region body
PF: predicated region fallthrough
CT: control target
= control target key end

     0   :  { %s420_s12 = smov 0   ;;  %s422_s13 = smov 0   ;;  %s471_s0 = inlined_call_operand.vmem [shape: f32[2,16,128], index: 0, kind: input, shape index: {}]   ;;  %s472_s1 = inlined_call_operand.vmem [shape: f32[1,128], index: 1, kind: input, shape index: {}]   ;;  %s473_s2 = inlined_call_operand.vmem [shape: f32[1,128], index: 2, kind: input, shape index: {}]   ;;  %s474_s3 = inlined_call_operand.vmem [shape: f32[2,16,128], index: 3, kind: output, shape index: {}]  }
   0x1   :  { %s424_s14 = smov 0   ;;  %s426_s15 = smov 0  }
   0x2   :  { %s428_s16 = smov 0  }
   0x3 LB: > { %s22_s17 = sadd.s32 1, %s390_s14  ;;  %s25_s18 = sadd.s32 1, %s394_s15  ;;  %s398_s16 = sphi %s428_s16, %s13_s16   ;;  %s394_s15 = sphi %s426_s15, %s478_s15   ;;  %s390_s14 = sphi %s424_s14, %s477_s14   ;;  %s386_s13 = sphi %s422_s13, %s476_s13   ;;  %s382_s12 = sphi %s420_s12, %s475_s12  }
   0x4   : > { %p23_p0 = scmp.ge.s32.totalorder %s22_s17, 2  ;;  %p311_p1 = scmp.ge.s32.totalorder %s398_s16, 1 }
   0x5   : > { %p156_p2 = scmp.lt.s32.totalorder %s398_s16, 5 }
   0x6   : > { %s480_s17 = smov (%p23_p0, %s22_s17), 0  ;;  %s482_s18 = smov (!%p23_p0, %s25_s18), %s394_s15 }
   0x7   : > { %p157_p3 = pnand %p311_p1, %p156_p2  ;;  %p27_p4 = scmp.ge.s32.totalorder %s482_s18, 2 }
   0x8   : > { %p186_p5 = scmp.lt.s32.totalorder (!%p157_p3), %s386_s13, 1  ;;  %p188_p6 = scmp.lt.s32.totalorder (!%p157_p3), %s382_s12, 1  ;;  %v316_v0 = vld [vmem:[%s472_s1] ss:$0 sm:$0xff] (!%p157_p3) }
   0x9   : > { %s484_s18 = smov (%p27_p4, %s482_s18), 0  ;;  %160 = sbr.rel (%p157_p3) target bundleno = 29 (0x1d), region = 32 }
   0xa   : > { %v317_v2 = vld [vmem:[%s473_s2] ss:$0 sm:$0xff] (!%p157_p3) }
  0x10   : > { %s486_s13 = smov (!%p186_p5, %s386_s13), 1  ;;  %s488_s12 = smov (!%p188_p6, %s382_s12), 1 }
  0x11   : > { %s312_s19 = sshll.u32 %s486_s13, 1 }
  0x12   : > { %s191_s20 = sadd.s32 %s312_s19, %s488_s12 }
  0x13   : > { %s313_s21 = sshll.u32 %s191_s20, 3 }
  0x14   : > { %s193_s26 = scalar_lea.vmem %s471_s0, %s313_s21  ;;  %s201_s4 = scalar_lea.vmem %s474_s3, %s313_s21 }
  0x15   : > { %v202_v1 = vld [vmem:[%s193_s26] sm:$0xff] }
  0x16   : > { %v210_v3 = vmul.f32 %v316_v0, %v202_v1 }
  0x18   : > { %v218_v4 = vadd.f32 %v317_v2, %v210_v3 }
  0x1a   : > { %v219_v5 = vmax.f32 %v218_v4, 0.0 }
  0x1c   : > { %220 = vst [vmem:[%s201_s4] sm:$0xff] %v219_v5 }
  0x1d PF: > { %s13_s16 = sadd.s32 1, %s398_s16   ;;  %s475_s12 = smov %s390_s14 }
  0x1e   : > { %p10_p7 = scmp.ge.s32.totalorder %s13_s16, 6   ;;  %s476_s13 = smov %s394_s15 }
  0x1f   : > { %s477_s14 = smov %s480_s17  ;;  %s478_s15 = smov %s484_s18 }
  0x20   :  { %12 = sbr.rel (!%p10_p7) target bundleno = 3 (0x3), region = 62 }

// kernel: sepcbr_forward.2
= control target key start
LH: loop header
LB: loop body
LE: loop exit
PB: predicated region body
PF: predicated region fallthrough
CT: control target
= control target key end

     0   :  { %s779_s15 = smov 0   ;;  %s781_s16 = smov 0   ;;  %s897_s0 = inlined_call_operand.vmem [shape: f32[2,18,72], index: 0, kind: input, shape index: {}]   ;;  %s898_s1 = inlined_call_operand.vmem [shape: f32[9,64], index: 1, kind: input, shape index: {}]   ;;  %s899_s2 = inlined_call_operand.vmem [shape: f32[64,128], index: 2, kind: input, shape index: {}]   ;;  %s900_s3 = inlined_call_operand.vmem [shape: f32[2,16,128], index: 3, kind: output, shape index: {0}]   ;;  %s901_s4 = inlined_call_operand.vmem [shape: f32[2,2,2,128], index: 4, kind: output, shape index: {1}]  }
   0x1   :  { %s783_s17 = smov 0   ;;  %s785_s18 = smov 0  }
   0x2   :  { %s787_s19 = smov 0  }
   0x3 LB: > { %s24_s20 = sadd.s32 1, %s737_s17  ;;  %s27_s21 = sadd.s32 1, %s741_s18  ;;  %s745_s19 = sphi %s787_s19, %s15_s19   ;;  %s741_s18 = sphi %s785_s18, %s905_s18   ;;  %s737_s17 = sphi %s783_s17, %s904_s17   ;;  %s733_s16 = sphi %s781_s16, %s903_s16   ;;  %s729_s15 = sphi %s779_s15, %s902_s15  }
   0x4   : > { %p25_p0 = scmp.ge.s32.totalorder %s24_s20, 2  ;;  %p596_p1 = scmp.ge.s32.totalorder %s745_s19, 1 }
   0x5   : > { %p181_p2 = scmp.lt.s32.totalorder %s745_s19, 5 }
   0x6   : > { %s907_s20 = smov (%p25_p0, %s24_s20), 0  ;;  %s909_s21 = smov (!%p25_p0, %s27_s21), %s741_s18 }
   0x7   : > { %p182_p3 = pnand %p596_p1, %p181_p2  ;;  %p29_p4 = scmp.ge.s32.totalorder %s909_s21, 2 }
   0x8   : > { %v604_v0 = vld [vmem:[%s898_s1 + $0x1] ss:$0 sm:$0xff] (!%p182_p3)  ;;  %s747_s24 = smov (!%p182_p3), 4   ;;  %v609_v1 = vld [vmem:[%s898_s1 + $0x4] ss:$0 sm:$0xff] (!%p182_p3)  ;;  %s748_s5 = smov (!%p182_p3), 8  }
   0x9   : > { %s911_s21 = smov (%p29_p4, %s909_s21), 0  ;;  %185 = sbr.rel (%p182_p3) target bundleno = 487 (0x1e7), region = 32 }
   0xa   : > { %255 = vrot.lane.b32.xlu0 (!%p182_p3), %v604_v0, %s747_s24  ;;  %v605_v2 = vld [vmem:[%s898_s1 + $0x2] ss:$0 sm:$0xff] (!%p182_p3)  ;;  %295 = vrot.lane.b32.xlu1 (!%p182_p3), %v609_v1, %s747_s24  ;;  %v610_v3 = vld [vmem:[%s898_s1 + $0x5] ss:$0 sm:$0xff] (!%p182_p3)  ;;  %p218_p5 = scmp.lt.s32.totalorder (!%p182_p3), %s733_s16, 1  ;;  %v749_v8 = vmov (!%p182_p3), 0.0|0.0  }
   0xb   : > { %v614_v4 = vld [vmem:[%s898_s1 + $0x7] ss:$0 sm:$0xff] (!%p182_p3)  ;;  %v615_v5 = vld [vmem:[%s898_s1 + $0x8] ss:$0 sm:$0xff] (!%p182_p3)  ;;  %647 = vmatprep.subr.bf16.mxu0 (!%p182_p3), %v749_v8  ;;  %s602_s25 = sshll.u32 (!%p182_p3), %s729_s15, 3  ;;  %v361_v10 = vld [vmem:[%s899_s2 + $0x10] sm:$0xff] (!%p182_p3) }
   0xc   : > { %v359_v6 = vld [vmem:[%s899_s2] sm:$0xff] (!%p182_p3)  ;;  %v360_v7 = vld [vmem:[%s899_s2 + $0x8] sm:$0xff] (!%p182_p3)  ;;  %v362_v11 = vld [vmem:[%s899_s2 + $0x18] sm:$0xff] (!%p182_p3)  ;;  %s750_s13 = smov (!%p182_p3), 124   ;;  %s751_s14 = smov (!%p182_p3), 120   ;;  %vm752_vm0 = vmmov (!%p182_p3), 0  }
   0xd   : > { %v648_v9 = vpack.c.bf16 (!%p182_p3), %v360_v7, %v359_v6  ;;  %v651_v12 = vpack.c.bf16 (!%p182_p3), %v362_v11, %v361_v10  ;;  %v363_v14 = vld [vmem:[%s899_s2 + $0x20] sm:$0xff] (!%p182_p3)  ;;  %v364_v15 = vld [vmem:[%s899_s2 + $0x28] sm:$0xff] (!%p182_p3)  ;;  %v365_v21 = vld [vmem:[%s899_s2 + $0x30] sm:$0xff] (!%p182_p3)  ;;  %v753_v31 = vmov (!%p182_p3), 0.0   ;;  %vm367_vm1 = vcmask (!%p182_p3), 523264   ;;  %p225_p6 = scmp.lt.s32.totalorder (!%p182_p3), %s729_s15, 1 }
   0xe   : > { %270 = vrot.lane.b32.xlu0 (!%p182_p3), %v605_v2, %s748_s5  ;;  %310 = vrot.lane.b32.xlu1 (!%p182_p3), %v610_v3, %s748_s5  ;;  %v654_v16 = vpack.c.bf16 (!%p182_p3), %v364_v15, %v363_v14  ;;  %v366_v22 = vld [vmem:[%s899_s2 + $0x38] sm:$0xff] (!%p182_p3)  ;;  %v603_v35 = vld [vmem:[%s898_s1] ss:$0 sm:$0xff] (!%p182_p3) }
   0xf   : > { %649 = vmatpush3.bf16.msra.mxu0 (!%p182_p3), %v648_v9  ;;  %v657_v24 = vpack.c.bf16 (!%p182_p3), %v366_v22, %v365_v21  ;;  %644 = vmatprep.mubr.msk.f32.mxu0 (!%p182_p3), %vm752_vm0, %v753_v31  ;;  %v608_v38 = vld [vmem:[%s898_s1 + $0x3] ss:$0 sm:$0xff] (!%p182_p3)  ;;  %v613_v43 = vld [vmem:[%s898_s1 + $0x6] ss:$0 sm:$0xff] (!%p182_p3) }
  0x10   : > { %s913_s16 = smov (!%p218_p5, %s733_s16), 1  ;;  %650 = vmatprep.subr.bf16.mxu0 %v749_v8  ;;  %s915_s15 = smov (!%p225_p6, %s729_s15), 1 }
  0x11   : > { %s659_s10 = smul.u32 24, %s913_s16  ;;  %s598_s28 = sshll.u32 %s913_s16, 1 }
  0x12   : > { %335 = vrot.lane.b32.xlu0 %v614_v4, %s747_s24  ;;  %350 = vrot.lane.b32.xlu1 %v615_v5, %s748_s5  ;;  %s228_s29 = sadd.s32 %s598_s28, %s915_s15 }
  0x13   : > { %s222_s24 = scalar_lea.vmem %s897_s0, %s659_s10  ;;  %652 = vmatpush3.bf16.msra.mxu0 %v651_v12  ;;  %s601_s8 = sshll.u32 %s228_s29, 1 }
  0x14   : > { %s240_s30 = scalar_lea.vmem %s222_s24, %s602_s25  ;;  %653 = vmatprep.subr.bf16.mxu0 %v749_v8  ;;  %s238_s9 = scalar_lea.vmem %s901_s4, %s601_s8 }
  0x15   : > { %v241_v13 = vld [vmem:[%s240_s30] sm:$0xff] }
  0x16   : > { %v607_v18 = vld [vmem:[%s240_s30 + $0x1] sm:$0xff]  ;;  %v247_v36 = vmul.f32 %v603_v35, %v241_v13 }
  0x17   : > { %655 = vmatpush3.bf16.msra.mxu0 %v654_v16  ;;  %v612_v28 = vld [vmem:[%s240_s30 + $0x2] sm:$0xff]  ;;  %v287_v40 = vmul.f32 %v608_v38, %v607_v18  ;;  %s599_s30 = sshll.u32 %s228_s29, 3 }
  0x18   : > { %656 = vmatprep.subr.bf16.mxu0 %v749_v8  ;;  %v327_v48 = vmul.f32 %v613_v43, %v612_v28  ;;  %s230_s7 = scalar_lea.vmem %s900_s3, %s599_s30 }
  0x1b   : > { %658 = vmatpush3.bf16.msra.mxu0 %v657_v24 }
  0x7c   : > { %v256_v17 = vpop.permute.xlu0 %255  ;;  %v296_v20 = vpop.permute.xlu1 %295 }
  0x7d   : > { %v258_v19 = vmul.f32 %v256_v17, %v241_v13  ;;  %v298_v23 = vmul.f32 %v607_v18, %v296_v20 }
  0x7f   : > { %260 = vrot.lane.b32.xlu0 %v258_v19, %s750_s13 }
  0x80   : > { %v271_v25 = vpop.permute.xlu0 %270  ;;  %v311_v27 = vpop.permute.xlu1 %310 }
  0x81   : > { %v273_v26 = vmul.f32 %v271_v25, %v241_v13  ;;  %v313_v29 = vmul.f32 %v607_v18, %v311_v27 }
  0x83   : > { %275 = vrot.lane.b32.xlu1 %v273_v26, %s751_s14  ;;  %300 = vrot.lane.b32.xlu0 %v298_v23, %s750_s13 }
  0x84   : > { %v336_v30 = vpop.permute.xlu0 %335  ;;  %v351_v33 = vpop.permute.xlu1 %350 }
  0x85   : > { %v338_v32 = vmul.f32 %v612_v28, %v336_v30  ;;  %v353_v34 = vmul.f32 %v612_v28, %v351_v33 }
  0x87   : > { %315 = vrot.lane.b32.xlu1 %v313_v29, %s751_s14  ;;  %340 = vrot.lane.b32.xlu0 %v338_v32, %s750_s13 }
  0x8b   : > { %355 = vrot.lane.b32.xlu1 %v353_v34, %s751_s14 }
  0xf1   : > { %v261_v37 = vpop.permute.xlu0 %260 }
  0xf2   : > { %v263_v39 = vadd.f32 %v261_v37, %v247_v36 }
  0xf5   : > { %v276_v41 = vpop.permute.xlu1 %275  ;;  %v301_v45 = vpop.permute.xlu0 %300 }
  0xf6   : > { %v278_v42 = vadd.f32 %v276_v41, %v263_v39 }
  0xf8   : > { %v288_v44 = vadd.f32 %v287_v40, %v278_v42 }
  0xf9   : > { %v316_v46 = vpop.permute.xlu1 %315  ;;  %v341_v50 = vpop.permute.xlu0 %340 }
  0xfa   : > { %v303_v47 = vadd.f32 %v301_v45, %v288_v44 }
  0xfc   : > { %v318_v49 = vadd.f32 %v316_v46, %v303_v47 }
  0xfd   : > { %v356_v52 = vpop.permute.xlu1 %355 }
  0xfe   : > { %v328_v51 = vadd.f32 %v327_v48, %v318_v49 }
 0x100   : > { %v343_v53 = vadd.f32 %v341_v50, %v328_v51 }
 0x102   : > { %v358_v54 = vadd.f32 %v356_v52, %v343_v53 }
 0x104   : > { %645 = vmatmul.mubr.msk.f32.vlgmr.msra.gmra.mrb[0].mxu0 %vm367_vm1, %v358_v54 }
 0x1d7   : > { %v437_v55 = vpop.f32.mrb[0].mxu0 }
 0x1d8   : > { %441 = vst [vmem:[%s230_s7] sm:$0xff] %v437_v55  ;;  %v442_v56 = vrot.slane %v437_v55, 4  ;;  %v449_v57 = vmul.f32 %v437_v55, %v437_v55  ;;  %v646_v58 = vpop.f32.mrb[1].mxu0 }
 0x1da   : > { %v443_v59 = vadd.f32 %v442_v56, %v437_v55  ;;  %v450_v60 = vrot.slane %v449_v57, 4 }
 0x1dc   : > { %v444_v61 = vrot.slane %v443_v59, 2  ;;  %v451_v62 = vadd.f32 %v450_v60, %v449_v57 }
 0x1de   : > { %v445_v63 = vadd.f32 %v444_v61, %v443_v59  ;;  %v452_v0 = vrot.slane %v451_v62, 2 }
 0x1e0   : > { %v446_v1 = vrot.slane %v445_v63, 1  ;;  %v453_v2 = vadd.f32 %v452_v0, %v451_v62 }
 0x1e2   : > { %v447_v3 = vadd.f32 %v446_v1, %v445_v63  ;;  %v454_v4 = vrot.slane %v453_v2, 1 }
 0x1e4   : > { %448 = vst [vmem:[%s238_s9] sm:$0x1] %v447_v3  ;;  %v455_v5 = vadd.f32 %v454_v4, %v453_v2 }
 0x1e6   : > { %456 = vst [vmem:[%s238_s9 + $0x1] sm:$0x1] %v455_v5 }
 0x1e7 PF: > { %s15_s19 = sadd.s32 1, %s745_s19   ;;  %s902_s15 = smov %s737_s17 }
 0x1e8   : > { %p12_p7 = scmp.ge.s32.totalorder %s15_s19, 6   ;;  %s903_s16 = smov %s741_s18 }
 0x1e9   : > { %s904_s17 = smov %s907_s20  ;;  %s905_s18 = smov %s911_s21 }
 0x1ea   :  { %14 = sbr.rel (!%p12_p7) target bundleno = 3 (0x3), region = 77 }

</bundles_post_ra>
